<compile_context>
chip_gen: v5e
topology: v5e:2x2
jax: 0.10.0
libtpu: 0.0.40
codegen_flags: <defaults>
</compile_context>

<pallas_src>
import numpy as np
import jax
import jax.numpy as jnp
from jax.experimental import pallas as pl
from jax.experimental.pallas import tpu as pltpu

# ------------------------- loss configuration (module defaults) -------------------------
FUTURE_RETURNS_WEIGHT = 1.0
DIRECTIONS_WEIGHT = 3.0
LONG_LEVELS_WEIGHT = 1.0
SHORT_LEVELS_WEIGHT = 1.0
RISK_METRICS_WEIGHT = 0.5
LARGE_MOVE_WEIGHT = 5.0
LARGE_MOVE_THRESHOLD = 0.003
WARMUP_EPOCHS = 10

N_FEATURES = 20
FLATTEN = 32                      # batch rows folded into the lane dimension
LANES = N_FEATURES * FLATTEN      # 640 = 5 * 128 -> fully lane-dense vregs
DEFAULT_BLOCK_ROWS = 1024         # flattened rows per grid step (2.5 MiB per input per block)

# TODO(synk): focal-loss / label-smoothing / entropy / confidence branches and the stateful
# class-weight EMA only run when `outputs` carries `_direction_logits` / `_confidence_scores`
# attributes; the plain-tensor forward implemented here never executes them.


def _dynamic_direction_weight(current_epoch: int) -> float:
    if current_epoch < WARMUP_EPOCHS:
        return 1.0 + (DIRECTIONS_WEIGHT - 1.0) * (current_epoch / WARMUP_EPOCHS)
    return DIRECTIONS_WEIGHT


def _round_up(x: int, m: int) -> int:
    return (x + m - 1) // m * m


# ----------------------------------- Pallas kernel -----------------------------------
def _make_kernel(block_rows: int, n_valid_rows: int, needs_row_mask: bool):
    def kernel(out_ref, tgt_ref, partial_ref):
        o = out_ref[...]          # (TB, 640) f32 — model outputs, 32 batch rows per flat row
        t = tgt_ref[...]          # (TB, 640) f32 — raw targets

        # Per-lane column id (period-20 pattern over 640 lanes), built with float-only
        # VPU math (iota -> scaled floor) — no vector integer div/rem needed.
        lane = jax.lax.broadcasted_iota(jnp.int32, (1, LANES), 1).astype(jnp.float32)
        col = lane - jnp.floor(lane * (1.0 / N_FEATURES)) * float(N_FEATURES)   # exact 0..19
        is_fr = col < 4.0
        is_dir = jnp.logical_and(col >= 4.0, col < 8.0)
        is_bce = jnp.logical_and(col >= 8.0, col < 16.0)
        tscale = jnp.where(jnp.logical_or(is_fr, col >= 16.0), 0.01,
                           jnp.where(is_dir, 0.5, 1.0))                 # target scaling
        thr = jnp.where(is_fr, LARGE_MOVE_THRESHOLD, jnp.inf)           # large-move threshold

        t_s = t * tscale
        diff = o - t_s
        move_w = jnp.where(jnp.abs(t_s) > thr, LARGE_MOVE_WEIGHT, 1.0)  # 1 cmp + 1 select
        mse_elem = diff * diff * move_w

        # numerically stable BCE-with-logits (tscale == 1 on these columns, so t_s == t)
        bce_elem = jnp.maximum(o, 0.0) - o * t_s + jnp.log(1.0 + jnp.exp(-jnp.abs(o)))

        per_elem = jnp.where(is_bce, bce_elem, mse_elem)

        if needs_row_mask:
            # last grid block may read past the array end (undefined data) — zero it out
            row = (pl.program_id(0) * block_rows
                   + jax.lax.broadcasted_iota(jnp.int32, (o.shape[0], 1), 0))
            per_elem = jnp.where(row < n_valid_rows, per_elem, 0.0)

        # lane-resident partial sums; per-column weighting + final reduce happen once outside
        partial_ref[...] = jnp.sum(per_elem, axis=0, keepdims=True)     # (1, 640)

    return kernel


def directional_multi_task_loss(outputs, targets, *, current_epoch: int = 0,
                                block_rows: int = DEFAULT_BLOCK_ROWS):
    """outputs, targets: (B, 20) float32 -> scalar float32 loss."""
    B, F = outputs.shape
    assert F == N_FEATURES and targets.shape == (B, F)
    outputs = outputs.astype(jnp.float32)
    targets = targets.astype(jnp.float32)

    # Pad the batch to a multiple of FLATTEN so the (B,20)->(B/32,640) reshape is zero-copy.
    # Pad values are chosen so padded elements contribute exactly 0 loss:
    #   MSE cols: o=0, t=0 -> 0;  BCE cols: o=-100, t=0 -> 0 - 0 + log(1 + exp(-100)) == 0 in f32.
    B_pad = _round_up(B, FLATTEN)
    n_pad = B_pad - B
    if n_pad:
        pad_row = np.zeros((1, N_FEATURES), np.float32)
        pad_row[0, 8:16] = -100.0
        outputs = jnp.concatenate(
            [outputs, jnp.broadcast_to(jnp.asarray(pad_row), (n_pad, N_FEATURES))], axis=0)
        targets = jnp.concatenate(
            [targets, jnp.zeros((n_pad, N_FEATURES), jnp.float32)], axis=0)

    n_flat = B_pad // FLATTEN
    out_flat = outputs.reshape(n_flat, LANES)     # zero-copy row-major reshape
    tgt_flat = targets.reshape(n_flat, LANES)

    if n_flat <= block_rows:
        tb, n_blocks = n_flat, 1                  # single block equal to full array dims
    else:
        tb = _round_up(block_rows, 8)
        n_blocks = pl.cdiv(n_flat, tb)
    needs_row_mask = n_blocks * tb > n_flat

    partials = pl.pallas_call(
        _make_kernel(tb, n_flat, needs_row_mask),
        out_shape=jax.ShapeDtypeStruct((n_blocks, LANES), jnp.float32),
        grid=(n_blocks,),
        in_specs=[pl.BlockSpec((tb, LANES), lambda i: (i, 0)),
                  pl.BlockSpec((tb, LANES), lambda i: (i, 0))],
        out_specs=pl.BlockSpec((1, LANES), lambda i: (i, 0)),
        compiler_params=pltpu.CompilerParams(dimension_semantics=("parallel",)),
    )(out_flat, tgt_flat)

    # Per-column weights (task weight, dynamic direction weight, per-task mean 1/(B*4)),
    # tiled to the 640-lane pattern; applied once to the tiny (n_blocks, 640) partials.
    dyn_w = _dynamic_direction_weight(current_epoch)
    colw = np.zeros(N_FEATURES, np.float32)
    colw[0:4] = FUTURE_RETURNS_WEIGHT
    colw[4:8] = dyn_w * 0.5
    colw[8:12] = LONG_LEVELS_WEIGHT
    colw[12:16] = SHORT_LEVELS_WEIGHT
    colw[16:20] = RISK_METRICS_WEIGHT
    colw /= float(B * 4)                          # real B (padding contributes exactly 0)
    colw_lanes = jnp.asarray(np.tile(colw, FLATTEN))
    return jnp.sum(partials * colw_lanes[None, :])


# ------------------------------- pure-JAX reference -------------------------------
def reference_loss(o, t, *, current_epoch: int = 0):
    dyn_w = _dynamic_direction_weight(current_epoch)

    fr_t = t[:, 0:4] / 100.0
    mse = (o[:, 0:4] - fr_t) ** 2
    w = jnp.where(jnp.abs(fr_t) > LARGE_MOVE_THRESHOLD, LARGE_MOVE_WEIGHT, 1.0)
    fr_loss = jnp.mean(mse * w) * FUTURE_RETURNS_WEIGHT

    dir_loss = jnp.mean((o[:, 4:8] - t[:, 4:8] / 2.0) ** 2) * dyn_w * 0.5

    def bce(x, y):
        return jnp.maximum(x, 0.0) - x * y + jnp.log(1.0 + jnp.exp(-jnp.abs(x)))

    long_loss = jnp.mean(bce(o[:, 8:12], t[:, 8:12])) * LONG_LEVELS_WEIGHT
    short_loss = jnp.mean(bce(o[:, 12:16], t[:, 12:16])) * SHORT_LEVELS_WEIGHT
    risk_loss = jnp.mean((o[:, 16:20] - t[:, 16:20] / 100.0) ** 2) * RISK_METRICS_WEIGHT

    return fr_loss + dir_loss + long_loss + short_loss + risk_loss


if __name__ == "__main__":
    def make_inputs(key, B):
        k1, k2, k3, k4, k5 = jax.random.split(key, 5)
        outputs = jax.random.normal(k1, (B, N_FEATURES), jnp.float32)
        # realistic targets: returns/risk in percent units, direction classes {0,1,2}, binary levels
        returns_t = jax.random.normal(k2, (B, 4), jnp.float32)
        dir_t = jax.random.randint(k3, (B, 4), 0, 3).astype(jnp.float32)
        levels_t = jax.random.bernoulli(k4, 0.5, (B, 8)).astype(jnp.float32)
        risk_t = jax.random.normal(k5, (B, 4), jnp.float32) * 2.0
        targets = jnp.concatenate([returns_t, dir_t, levels_t, risk_t], axis=1)
        return outputs, targets

    # spec-sized small case (B=2): single lane-dense block
    o_small, t_small = make_inputs(jax.random.PRNGKey(0), 2)
    loss = jax.block_until_ready(directional_multi_task_loss(o_small, t_small))
    ref = reference_loss(o_small, t_small)
    assert bool(jnp.isfinite(loss))
    np.testing.assert_allclose(np.asarray(loss), np.asarray(ref), rtol=1e-4, atol=1e-5)

    # multi-block + tail-mask path (B not a multiple of 32, tiny block_rows forces >1 grid step)
    o_big, t_big = make_inputs(jax.random.PRNGKey(1), 300)
    loss2 = jax.block_until_ready(
        directional_multi_task_loss(o_big, t_big, block_rows=8))
    ref2 = reference_loss(o_big, t_big)
    np.testing.assert_allclose(np.asarray(loss2), np.asarray(ref2), rtol=1e-4, atol=1e-5)

    print("KERNEL_OK")
</pallas_src>

<mosaic_0001>
module attributes {stable_mosaic.version = 11 : i64} {
  func.func @kernel(%arg0: i32, %arg1: memref<1x640xf32, #tpu.memory_space<vmem>>, %arg2: memref<1x640xf32, #tpu.memory_space<vmem>>, %arg3: memref<1x640xf32, #tpu.memory_space<vmem>>) attributes {dimension_semantics = [#tpu.dimension_semantics<parallel>], iteration_bounds = array<i64: 1>, scalar_prefetch = 0 : i64, scratch_operands = 0 : i64, tpu.core_type = #tpu.core_type<tc>, window_params = [{transform_indices = @transform_0, window_bounds = array<i64: 1, 640>}, {transform_indices = @transform_1, window_bounds = array<i64: 1, 640>}, {transform_indices = @transform_2, window_bounds = array<i64: 1, 640>}]} {
    %c0 = arith.constant 0 : index
    %c0_0 = arith.constant 0 : index
    %0 = vector.load %arg1[%c0, %c0_0] : memref<1x640xf32, #tpu.memory_space<vmem>>, vector<1x640xf32>
    %c0_1 = arith.constant 0 : index
    %c0_2 = arith.constant 0 : index
    %1 = vector.load %arg2[%c0_1, %c0_2] : memref<1x640xf32, #tpu.memory_space<vmem>>, vector<1x640xf32>
    %2 = tpu.iota {dimensions = array<i32: 1>} : vector<1x640xi32>
    %3 = arith.sitofp %2 : vector<1x640xi32> to vector<1x640xf32>
    %cst = arith.constant 5.000000e-02 : f32
    %4 = vector.broadcast %cst : f32 to vector<1x640xf32>
    %5 = arith.mulf %3, %4 : vector<1x640xf32>
    %6 = math.floor %5 : vector<1x640xf32>
    %cst_3 = arith.constant 2.000000e+01 : f32
    %7 = vector.broadcast %cst_3 : f32 to vector<1x640xf32>
    %8 = arith.mulf %6, %7 : vector<1x640xf32>
    %9 = arith.subf %3, %8 : vector<1x640xf32>
    %cst_4 = arith.constant 4.000000e+00 : f32
    %10 = vector.broadcast %cst_4 : f32 to vector<1x640xf32>
    %11 = arith.cmpf olt, %9, %10 : vector<1x640xf32>
    %cst_5 = arith.constant 4.000000e+00 : f32
    %12 = vector.broadcast %cst_5 : f32 to vector<1x640xf32>
    %13 = arith.cmpf oge, %9, %12 : vector<1x640xf32>
    %cst_6 = arith.constant 8.000000e+00 : f32
    %14 = vector.broadcast %cst_6 : f32 to vector<1x640xf32>
    %15 = arith.cmpf olt, %9, %14 : vector<1x640xf32>
    %16 = arith.andi %13, %15 : vector<1x640xi1>
    %cst_7 = arith.constant 8.000000e+00 : f32
    %17 = vector.broadcast %cst_7 : f32 to vector<1x640xf32>
    %18 = arith.cmpf oge, %9, %17 : vector<1x640xf32>
    %cst_8 = arith.constant 1.600000e+01 : f32
    %19 = vector.broadcast %cst_8 : f32 to vector<1x640xf32>
    %20 = arith.cmpf olt, %9, %19 : vector<1x640xf32>
    %21 = arith.andi %18, %20 : vector<1x640xi1>
    %cst_9 = arith.constant 1.600000e+01 : f32
    %22 = vector.broadcast %cst_9 : f32 to vector<1x640xf32>
    %23 = arith.cmpf oge, %9, %22 : vector<1x640xf32>
    %24 = arith.ori %11, %23 : vector<1x640xi1>
    %cst_10 = arith.constant 5.000000e-01 : f32
    %cst_11 = arith.constant 1.000000e+00 : f32
    %25 = vector.broadcast %cst_10 : f32 to vector<1x640xf32>
    %26 = vector.broadcast %cst_11 : f32 to vector<1x640xf32>
    %27 = arith.select %16, %25, %26 : vector<1x640xi1>, vector<1x640xf32>
    %cst_12 = arith.constant 0.00999999977 : f32
    %28 = vector.broadcast %cst_12 : f32 to vector<1x640xf32>
    %29 = arith.select %24, %28, %27 : vector<1x640xi1>, vector<1x640xf32>
    %cst_13 = arith.constant 3.000000e-03 : f32
    %cst_14 = arith.constant 0x7F800000 : f32
    %30 = vector.broadcast %cst_13 : f32 to vector<1x640xf32>
    %31 = vector.broadcast %cst_14 : f32 to vector<1x640xf32>
    %32 = arith.select %11, %30, %31 : vector<1x640xi1>, vector<1x640xf32>
    %33 = arith.mulf %1, %29 : vector<1x640xf32>
    %34 = arith.subf %0, %33 : vector<1x640xf32>
    %35 = math.absf %33 : vector<1x640xf32>
    %36 = arith.cmpf ogt, %35, %32 : vector<1x640xf32>
    %cst_15 = arith.constant 5.000000e+00 : f32
    %cst_16 = arith.constant 1.000000e+00 : f32
    %37 = vector.broadcast %cst_15 : f32 to vector<1x640xf32>
    %38 = vector.broadcast %cst_16 : f32 to vector<1x640xf32>
    %39 = arith.select %36, %37, %38 : vector<1x640xi1>, vector<1x640xf32>
    %40 = arith.mulf %34, %34 : vector<1x640xf32>
    %41 = arith.mulf %40, %39 : vector<1x640xf32>
    %cst_17 = arith.constant 0.000000e+00 : f32
    %42 = vector.broadcast %cst_17 : f32 to vector<1x640xf32>
    %43 = arith.maximumf %0, %42 : vector<1x640xf32>
    %44 = arith.mulf %0, %33 : vector<1x640xf32>
    %45 = arith.subf %43, %44 : vector<1x640xf32>
    %46 = math.absf %0 : vector<1x640xf32>
    %cst_18 = arith.constant 0.000000e+00 : f32
    %47 = vector.broadcast %cst_18 : f32 to vector<1x640xf32>
    %48 = arith.subf %47, %46 : vector<1x640xf32>
    %49 = math.exp %48 : vector<1x640xf32>
    %cst_19 = arith.constant 1.000000e+00 : f32
    %50 = vector.broadcast %cst_19 : f32 to vector<1x640xf32>
    %51 = arith.addf %50, %49 : vector<1x640xf32>
    %52 = math.log %51 : vector<1x640xf32>
    %53 = arith.addf %45, %52 : vector<1x640xf32>
    %54 = arith.select %21, %53, %41 : vector<1x640xi1>, vector<1x640xf32>
    %cst_20 = arith.constant dense<0.000000e+00> : vector<640xf32>
    %55 = vector.multi_reduction <add>, %54, %cst_20 [0] : vector<1x640xf32> to vector<640xf32>
    %56 = vector.shape_cast %55 : vector<640xf32> to vector<1x640xf32>
    %c0_21 = arith.constant 0 : index
    %c0_22 = arith.constant 0 : index
    %57 = vector.load %arg3[%c0_21, %c0_22] : memref<1x640xf32, #tpu.memory_space<vmem>>, vector<1x640xf32>
    tpu.vector_store %arg3[%c0_21, %c0_22], %56 {strides = array<i32>} : memref<1x640xf32, #tpu.memory_space<vmem>>, vector<1x640xf32>,
    return
  }
  func.func @transform_0(%arg0: i32) -> (i32, i32) {
    %c0_i32 = arith.constant 0 : i32
    %c0_i32_0 = arith.constant 0 : i32
    return %arg0, %c0_i32 : i32, i32
  }
  func.func @transform_1(%arg0: i32) -> (i32, i32) {
    %c0_i32 = arith.constant 0 : i32
    %c0_i32_0 = arith.constant 0 : i32
    return %arg0, %c0_i32 : i32, i32
  }
  func.func @transform_2(%arg0: i32) -> (i32, i32) {
    %c0_i32 = arith.constant 0 : i32
    %c0_i32_0 = arith.constant 0 : i32
    return %arg0, %c0_i32 : i32, i32
  }
}

</mosaic_0001>

<bundles_post_ra>
// kernel: tpu_custom_call.1
= control target key start
LH: loop header
LB: loop body
LE: loop exit
PB: predicated region body
PF: predicated region fallthrough
CT: control target
= control target key end

     0   :  { %7 = vsyncpa [#allocation3], 0  ;;  %s516_s0 = inlined_call_operand.hbm [shape: f32[1,640], index: 0, kind: input, shape index: {}]   ;;  %s517_s1 = inlined_call_operand.hbm [shape: f32[1,640], index: 1, kind: input, shape index: {}]   ;;  %s518_s2 = inlined_call_operand.hbm [shape: f32[1,640], index: 2, kind: output, shape index: {}]  }
   0x1   :  { %8 = vsyncpa [#allocation6], 0 }
   0x2   :  { %9 = vsyncpa [#allocation4], 0  ;;  %s15_s11 = sshll.u32 %s516_s0, 4  ;;  %s339_s12 = smov [#allocation2]   ;;  %s16_s11 = int_to_ptr.hbm [resolvable:$true] %s15_s11 }
   0x3   :  { %s17_s13 = sshll.u32 %s339_s12, 4  ;;  %s26_s16 = sshll.u32 %s517_s1, 4  ;;  %s18_s13 = int_to_ptr.vmem [resolvable:$true] %s17_s13  ;;  %s27_s16 = int_to_ptr.hbm [resolvable:$true] %s26_s16 }
   0x4   :  { %20 = dma.hbm_to_vmem [thread:$0]  %s16_s11, 80, %s18_s13, [#allocation3]  }
   0x5   :  { %s340_s17 = smov [#allocation5]  }
   0x6   :  { %s28_s18 = sshll.u32 %s340_s17, 4  ;;  %s29_s18 = int_to_ptr.vmem [resolvable:$true] %s28_s18 }
   0x7   :  { %31 = dma.hbm_to_vmem [thread:$0]  %s27_s16, 80, %s29_s18, [#allocation6]  }
   0x8   :  { %333 = dma.done.wait [#allocation3], 80  }
   0x9   :  { %334 = vsyncadd [#allocation3], 4294967216 }
   0xa   :  { %335 = dma.done.wait [#allocation6], 80  }
   0xb   :  { %336 = vsyncadd [#allocation6], 4294967216  ;;  %v42_v0 = vlaneseq  ;;  %v366_v15 = vld [vmem:[#allocation2] sm:$0x1f]  ;;  %v341_v38 = vmov inf   ;;  %v342_v42 = vmov 1.0  }
   0xc   :  { %v175_v23 = vand.u32 2147483647, %v366_v15  ;;  %s343_s0 = smov [#allocation7]   ;;  %s241_s21 = sshll.u32 %s518_s2, 4  ;;  %s242_s21 = int_to_ptr.hbm [resolvable:$true] %s241_s21 }
   0xd   :  { %v43_v1 = vand.u32 127, %v42_v0  ;;  %s239_s1 = sshll.u32 %s343_s0, 4  ;;  %s240_s1 = int_to_ptr.vmem [resolvable:$true] %s239_s1 }
   0xe   :  { %v176_v29 = vsub.f32 0.0, %v175_v23 }
   0xf   :  { %v44_v2 = vadd.s32 128, %v43_v1  ;;  %v45_v3 = vadd.s32 256, %v43_v1  ;;  %v46_v4 = vadd.s32 384, %v43_v1  ;;  %v47_v5 = vadd.s32 512, %v43_v1 }
  0x10   :  { %v48_v6 = vcvt.s32.f32 %v43_v1  ;;  %v177_v34 = vmul.f32 1.442695, %v176_v29 }
  0x11   :  { %v49_v7 = vcvt.s32.f32 %v44_v2  ;;  %v50_v8 = vcvt.s32.f32 %v45_v3  ;;  %v51_v9 = vcvt.s32.f32 %v46_v4  ;;  %v52_v10 = vcvt.s32.f32 %v47_v5 }
  0x12   :  { %v53_v11 = vmul.f32 0.05, %v48_v6  ;;  %257 = vpow2.f32 %v177_v34 }
  0x13   :  { %v54_v12 = vmul.f32 0.05, %v49_v7  ;;  %v55_v13 = vmul.f32 0.05, %v50_v8  ;;  %v56_v14 = vmul.f32 0.05, %v51_v9 }
  0x14   :  { %v57_v16 = vmul.f32 0.05, %v52_v10  ;;  %v58_v17 = vfloor.f32 %v53_v11 }
  0x15   :  { %v59_v18 = vfloor.f32 %v54_v12  ;;  %v60_v19 = vfloor.f32 %v55_v13  ;;  %v61_v20 = vfloor.f32 %v56_v14  ;;  %v172_v14 = vmax.f32 %v366_v15, 0.0 }
  0x16   :  { %v62_v21 = vfloor.f32 %v57_v16  ;;  %v63_v22 = vmul.f32 20.0, %v58_v17 }
  0x17   :  { %v64_v24 = vmul.f32 20.0, %v59_v18  ;;  %v65_v25 = vmul.f32 20.0, %v60_v19  ;;  %v66_v26 = vmul.f32 20.0, %v61_v20 }
  0x18   :  { %v67_v27 = vmul.f32 20.0, %v62_v21  ;;  %v369_v28 = vsub.f32 %v48_v6, %v63_v22  ;;  %v258_v53 = vpop.eup %257 }
  0x19   :  { %v371_v30 = vsub.f32 %v49_v7, %v64_v24  ;;  %v373_v31 = vsub.f32 %v50_v8, %v65_v25  ;;  %v375_v32 = vsub.f32 %v51_v9, %v66_v26  ;;  %v179_v61 = vadd.f32 1.0, %v258_v53  ;;  %v41_v8 = vld [vmem:[#allocation5] sm:$0x1f] }
  0x1a   :  { %v377_v33 = vsub.f32 %v52_v10, %v67_v27  ;;  %vm78_vm0 = vcmp.ge.f32.partialorder %v369_v28, 4.0  ;;  %vm83_vm1 = vcmp.lt.f32.partialorder %v369_v28, 8.0  ;;  %vm73_vm15 = vcmp.lt.f32.partialorder %v369_v28, 4.0 }
  0x1b   :  { %vm79_vm2 = vcmp.ge.f32.partialorder %v371_v30, 4.0  ;;  %vm84_vm3 = vcmp.lt.f32.partialorder %v371_v30, 8.0  ;;  %vm80_vm4 = vcmp.ge.f32.partialorder %v373_v31, 4.0  ;;  %vm85_vm5 = vcmp.lt.f32.partialorder %v373_v31, 8.0  ;;  %vm387_vm8 = vmand %vm78_vm0, %vm83_vm1 }
  0x1c   :  { %vm86_vm7 = vcmp.lt.f32.partialorder %v375_v32, 8.0  ;;  %vm519_vm11 = vcmp.lt.f32.partialorder %v371_v30, 4.0  ;;  %vm82_vm12 = vcmp.ge.f32.partialorder %v377_v33, 4.0  ;;  %vm87_vm13 = vcmp.lt.f32.partialorder %v377_v33, 8.0  ;;  %vm394_vm14 = vmand %vm79_vm2, %vm84_vm3 }
  0x1d   :  { %vm399_vm6 = vmand %vm80_vm4, %vm85_vm5  ;;  %vm108_vm0 = vcmp.ge.f32.partialorder %v369_v28, 16.0  ;;  %v129_v39 = vsel %vm519_vm11, 0.003, %v341_v38  ;;  %vm75_vm10 = vcmp.lt.f32.partialorder %v373_v31, 4.0  ;;  %vm76_vm2 = vcmp.lt.f32.partialorder %v375_v32, 4.0 }
  0x1e   :  { %vm77_vm3 = vcmp.lt.f32.partialorder %v377_v33, 4.0  ;;  %vm526_vm4 = vcmp.ge.f32.partialorder %v375_v32, 4.0  ;;  %vm109_vm9 = vcmp.ge.f32.partialorder %v371_v30, 16.0  ;;  %vm420_vm11 = vmand %vm82_vm12, %vm87_vm13  ;;  %vm110_vm1 = vcmp.ge.f32.partialorder %v373_v31, 16.0 }
  0x1f   :  { %vm413_vm5 = vmand %vm526_vm4, %vm86_vm7  ;;  %v118_v43 = vsel %vm387_vm8, 0.5, %v342_v42  ;;  %v119_v44 = vsel %vm394_vm14, 0.5, %v342_v42  ;;  %v130_v45 = vsel %vm75_vm10, 0.003, %v341_v38  ;;  %vm111_vm7 = vcmp.ge.f32.partialorder %v375_v32, 16.0 }
  0x20   :  { %vm436_vm12 = vmor %vm73_vm15, %vm108_vm0  ;;  %v120_v47 = vsel %vm399_vm6, 0.5, %v342_v42  ;;  %v131_v48 = vsel %vm76_vm2, 0.003, %v341_v38  ;;  %v159_v49 = vrot.slane %v129_v39, 7  ;;  %vm112_vm8 = vcmp.ge.f32.partialorder %v377_v33, 16.0 }
  0x21   :  { %vm533_vm13 = vcmp.lt.f32.partialorder %v371_v30, 4.0  ;;  %v121_v50 = vsel %vm413_vm5, 0.5, %v342_v42  ;;  %v128_v51 = vsel %vm73_vm15, 0.003, %v341_v38  ;;  %v132_v52 = vsel %vm77_vm3, 0.003, %v341_v38  ;;  %vm115_vm6 = vmor %vm75_vm10, %vm110_vm1 }
  0x22   :  { %vm114_vm14 = vmor %vm533_vm13, %vm109_vm9  ;;  %v122_v54 = vsel %vm420_vm11, 0.5, %v342_v42  ;;  %v123_v55 = vsel %vm436_vm12, 0.01, %v118_v43  ;;  %v160_v57 = vrot.slane %v130_v45, 6  ;;  %v125_v58 = vsel %vm115_vm6, 0.01, %v120_v47 }
  0x23   :  { %v124_v56 = vsel %vm114_vm14, 0.01, %v119_v44  ;;  %vm116_vm9 = vmor %vm76_vm2, %vm111_vm7  ;;  %v161_v60 = vrot.slane %v131_v48, 5  ;;  %v139_v63 = vrot.slane %v125_v58, 6  ;;  %v162_v1 = vrot.slane %v132_v52, 4 }
  0x24   :  { %v138_v59 = vrot.slane %v124_v56, 7  ;;  %vm117_vm10 = vmor %vm77_vm3, %vm112_vm8  ;;  %v126_v62 = vsel %vm116_vm9, 0.01, %v121_v50  ;;  %vm534_vm11 = vcmask 1040384   ;;  %259 = vlog2.f32 %v179_v61 }
  0x25   :  { %v163_v2 = vsel %vm534_vm11, %v128_v51, %v159_v49  ;;  %v127_v3 = vsel %vm117_vm10, 0.01, %v122_v54  ;;  %v140_v4 = vrot.slane %v126_v62, 5  ;;  %vm535_vm15 = vmmov %vm534_vm11  ;;  %vm536_vm0 = vcmask 1041408  }
  0x26   :  { %v143_v5 = vsel %vm535_vm15, %v123_v55, %v138_v59  ;;  %v141_v6 = vrot.slane %v127_v3, 4  ;;  %vm148_vm1 = vcmask 1042432   ;;  %vm537_vm2 = vcmask 1043459   ;;  %vm538_vm4 = vmmov %vm536_vm0 }
  0x27   :  { %v145_v7 = vsel %vm536_vm0, %v143_v5, %v139_v63  ;;  %v164_v10 = vsel %vm538_vm4, %v163_v2, %v160_v57  ;;  %vm539_vm3 = vmmov %vm537_vm2  ;;  %vm93_vm5 = vcmp.ge.f32.partialorder %v369_v28, 8.0  ;;  %vm98_vm7 = vcmp.lt.f32.partialorder %v369_v28, 16.0 }
  0x28   :  { %v147_v9 = vsel %vm537_vm2, %v140_v4, %v141_v6  ;;  %v165_v11 = vsel %vm539_vm3, %v161_v60, %v162_v1  ;;  %vm94_vm12 = vcmp.ge.f32.partialorder %v371_v30, 8.0  ;;  %vm95_vm8 = vcmp.ge.f32.partialorder %v373_v31, 8.0  ;;  %vm492_vm11 = vmand %vm93_vm5, %vm98_vm7 }
  0x29   :  { %v149_v12 = vsel %vm148_vm1, %v145_v7, %v147_v9  ;;  %v166_v17 = vsel %vm148_vm1, %v164_v10, %v165_v11  ;;  %vm99_vm13 = vcmp.lt.f32.partialorder %v371_v30, 16.0  ;;  %vm100_vm14 = vcmp.lt.f32.partialorder %v373_v31, 16.0 }
  0x2a   :  { %v151_v13 = vmul.f32 %v149_v12, %v41_v8  ;;  %v260_v16 = vpop.eup %259  ;;  %vm96_vm9 = vcmp.ge.f32.partialorder %v375_v32, 8.0  ;;  %vm101_vm10 = vcmp.lt.f32.partialorder %v375_v32, 16.0  ;;  %vm97_vm15 = vcmp.ge.f32.partialorder %v377_v33, 8.0  ;;  %vm498_vm2 = vmand %vm94_vm12, %vm99_vm13 }
  0x2b   :  { %v181_v21 = vmul.f32 0.6931472, %v260_v16  ;;  %vm102_vm0 = vcmp.lt.f32.partialorder %v377_v33, 16.0  ;;  %vm105_vm4 = vmand %vm95_vm8, %vm100_vm14  ;;  %vm544_vm7 = vcmask 1040384   ;;  %vm231_vm12 = vcmp.lt.s32.totalorder %v42_v0, 640 }
  0x2c   :  { %v152_v18 = vsub.f32 %v366_v15, %v151_v13  ;;  %v153_v19 = vand.u32 2147483647, %v151_v13  ;;  %v173_v20 = vmul.f32 %v151_v13, %v366_v15  ;;  %vm106_vm3 = vmand %vm96_vm9, %vm101_vm10  ;;  %vm545_vm8 = vcmask 1041408  }
  0x2d   :  { %vm107_vm5 = vmand %vm97_vm15, %vm102_vm0  ;;  %vm546_vm13 = vcmask 1043459  }
  0x2e   :  { %vm168_vm6 = vcmp.gt.f32.partialorder %v153_v19, %v166_v17  ;;  %v170_v22 = vmul.f32 %v152_v18, %v152_v18  ;;  %v174_v23 = vsub.f32 %v172_v14, %v173_v20 }
  0x2f   :  { %v169_v24 = vsel %vm168_vm6, 5.0, %v342_v42 }
  0x30   :  { %v171_v26 = vmul.f32 %v170_v22, %v169_v24  ;;  %v182_v27 = vadd.f32 %v181_v21, %v174_v23 }
  0x32   :  { %v184_v28 = vperm.slane %v182_v27, 0  ;;  %v185_v29 = vperm.slane %v182_v27, 1  ;;  %v186_v30 = vperm.slane %v182_v27, 2  ;;  %v187_v32 = vperm.slane %v182_v27, 3 }
  0x33   :  { %v188_v34 = vperm.slane %v182_v27, 4  ;;  %v195_v35 = vperm.slane %v171_v26, 0  ;;  %v196_v36 = vperm.slane %v171_v26, 1  ;;  %v197_v37 = vperm.slane %v171_v26, 2 }
  0x34   :  { %v198_v33 = vperm.slane %v171_v26, 3  ;;  %v199_v38 = vperm.slane %v171_v26, 4 }
  0x35   :  { %v205_v39 = vsel %vm492_vm11, %v184_v28, %v195_v35  ;;  %v206_v40 = vsel %vm498_vm2, %v185_v29, %v196_v36  ;;  %v207_v31 = vsel %vm105_vm4, %v186_v30, %v197_v37 }
  0x36   :  { %v208_v41 = vsel %vm106_vm3, %v187_v32, %v198_v33  ;;  %v209_v42 = vsel %vm107_vm5, %v188_v34, %v199_v38  ;;  %v220_v43 = vrot.slane %v206_v40, 7  ;;  %v221_v44 = vrot.slane %v207_v31, 6 }
  0x37   :  { %v222_v45 = vrot.slane %v208_v41, 5  ;;  %v223_v46 = vrot.slane %v209_v42, 4 }
  0x38   :  { %v224_v47 = vsel %vm544_vm7, %v205_v39, %v220_v43 }
  0x39   :  { %v225_v48 = vsel %vm545_vm8, %v224_v47, %v221_v44  ;;  %v226_v49 = vsel %vm546_vm13, %v222_v45, %v223_v46 }
  0x3a   :  { %v227_v50 = vsel %vm148_vm1, %v225_v48, %v226_v49 }
  0x3b   :  { %233 = vst.msk [vmem:[#allocation7] sm:$0x1f] %vm231_vm12, %v227_v50 }
  0x3c   :  { %244 = dma.vmem_to_hbm [thread:$0]  %s240_s1, 80, %s242_s21, [#allocation4]  }
  0x3d   :  { %337 = dma.done.wait [#allocation4], 80  }
  0x3e   :  { %338 = vsyncadd [#allocation4], 4294967216 }
  0x3f   :  { %249 = vsyncpa [#allocation3], 1 }
  0x40   :  { %250 = vsyncpa [#allocation6], 1 }
  0x41   :  { %251 = vsyncpa [#allocation4], 1 }

</bundles_post_ra>
